<compile_context>
chip_gen: v5e
topology: v5e:2x2
jax: 0.10.0
libtpu: 0.0.40
codegen_flags: <defaults>
</compile_context>

<pallas_src>
import functools

import jax
import jax.numpy as jnp
from jax import lax
from jax.experimental import pallas as pl
from jax.experimental.pallas import tpu as pltpu


def conv1d_nn_attn_kernel(x_ref, wqkv_ref, wo_ref, wtap_ref, cb_ref, o_ref, *, K):
    Bt, C_in, T = x_ref.shape
    C_out = o_ref.shape[1]
    f32 = jnp.float32

    x = x_ref[...].astype(f32)                                        # (Bt, C_in, T)

    # --- fused Q/K/V projection: one batched matmul against (T, 3T) = [Wq^T|Wk^T|Wv^T]
    wqkv = jnp.broadcast_to(wqkv_ref[...].astype(f32)[None], (Bt, T, 3 * T))
    qkv = jnp.einsum('bct,btu->bcu', x, wqkv, preferred_element_type=f32)
    q = qkv[:, :, 0 * T:1 * T]                                        # (Bt, C_in, T)
    k = qkv[:, :, 1 * T:2 * T]
    v = qkv[:, :, 2 * T:3 * T]

    # --- cosine similarity, L2-normalized over the channel axis (rsqrt -> EUP).
    # k is used transposed so its norm is a lane reduction and the sim matmul is
    # in canonical batched (b,m,k)x(b,k,n) form.
    kt = jnp.transpose(k, (0, 2, 1))                                  # (Bt, T, C_in)
    kt = kt * lax.rsqrt(jnp.maximum(jnp.sum(kt * kt, axis=-1, keepdims=True), 1e-24))
    qn = q * lax.rsqrt(jnp.maximum(jnp.sum(q * q, axis=1, keepdims=True), 1e-24))
    sim = jnp.einsum('btc,bcs->bts', kt, qn, preferred_element_type=f32)  # (Bt, T, T)
    sim = jnp.maximum(sim, 0.0)

    # --- pre-apply all K conv taps to v in one matmul:
    #   u_all[b, kk*C_out + o, j] = sum_c conv_w[o, c, kk] * v[b, c, j]
    wtap = jnp.broadcast_to(wtap_ref[...].astype(f32)[None], (Bt, K * C_out, C_in))
    u_all = jnp.einsum('bmc,bcj->bmj', wtap, v, preferred_element_type=f32)

    # --- packed selection keys: sim >= 0, so its fp32 bit pattern is order
    # preserving as int32.  Clobber the low ceil(log2(T)) mantissa bits with
    # (T-1-col) so a single max-reduce returns both the max value and its lowest
    # tied column (first-occurrence order, like lax.top_k).  Ties closer than
    # 2^idx_bits ulps resolve by column index, which is immaterial in practice.
    idx_bits = max(1, (T - 1).bit_length())
    idx_mask = (1 << idx_bits) - 1
    j_ids = lax.broadcasted_iota(jnp.int32, (Bt, T, T), 1)
    s_ids = lax.broadcasted_iota(jnp.int32, (Bt, T, T), 2)
    sim_bits = jnp.maximum(pltpu.bitcast(sim, jnp.int32), 0)          # squash any -0.0
    key = (sim_bits & jnp.int32(~idx_mask)) | (jnp.int32(T - 1) - s_ids)

    # Conv accumulator, initialized with the conv bias.
    acc = jnp.broadcast_to(cb_ref[...].astype(f32)[None], (Bt, C_out, T))

    # --- fused top-K selection + one-hot gather matmul + conv accumulation.
    for kk in range(K):
        m = jnp.max(key, axis=-1)                                     # (Bt, T): one reduce/pick
        idx = jnp.int32(T - 1) - (m & jnp.int32(idx_mask))            # argmax column
        g = (j_ids == idx[:, None, :]).astype(f32)                    # (Bt, T, T) one-hot gather
        u_k = u_all[:, kk * C_out:(kk + 1) * C_out, :]                # (Bt, C_out, T)
        acc = acc + jnp.einsum('boj,bjt->bot', u_k, g, preferred_element_type=f32)
        # Mask the chosen column; live keys are >= 0 so -1 never wins.
        key = jnp.where(s_ids == idx[:, :, None], jnp.int32(-1), key)

    # --- output projection W_o (acts on the token axis).
    wo = jnp.broadcast_to(wo_ref[...].astype(f32)[None], (Bt, T, T))
    out = jnp.einsum('bot,btj->boj', acc, wo, preferred_element_type=f32)
    o_ref[...] = out.astype(o_ref.dtype)


def _pick_batch_block(B, T):
    """Bt per grid step: aim for Bt*T ~ 128 lanes, keep >= 2 grid steps if possible."""
    target = max(1, 128 // max(T, 1))
    divisors = [d for d in range(1, B + 1) if B % d == 0]
    cands = [d for d in divisors if d <= target and B // d >= 2]
    if not cands:
        cands = [d for d in divisors if d <= target] or [1]
    return max(cands)


def prepare_params(wq, wk, wv, wo, conv_w, conv_b):
    """One-time weight preparation (hoisted out of the per-call path)."""
    T = wq.shape[0]
    C_out, C_in, K = conv_w.shape
    wqkv_t = jnp.concatenate([wq.T, wk.T, wv.T], axis=1)              # (T, 3T)
    wo_t = wo.T                                                       # (T, T)
    # conv taps stacked along output channels: row kk*C_out + o holds conv_w[o, :, kk]
    w_taps = jnp.transpose(conv_w, (2, 0, 1)).reshape(K * C_out, C_in)
    cb = conv_b.reshape(C_out, 1)
    return wqkv_t, wo_t, w_taps, cb


def conv1d_nn_attn(x, wqkv_t, wo_t, w_taps, cb, K, *, batch_block=None):
    B, C_in, T = x.shape
    KC_out = w_taps.shape[0]
    C_out = KC_out // K
    if K > T:
        raise ValueError("K must be <= number of tokens T")
    Bt = batch_block or _pick_batch_block(B, T)
    assert B % Bt == 0, (B, Bt)
    grid = (B // Bt,)
    kernel = functools.partial(conv1d_nn_attn_kernel, K=K)
    return pl.pallas_call(
        kernel,
        out_shape=jax.ShapeDtypeStruct((B, C_out, T), x.dtype),
        grid=grid,
        in_specs=[
            pl.BlockSpec((Bt, C_in, T), lambda g: (g, 0, 0)),         # x batch slab
            pl.BlockSpec((T, 3 * T), lambda g: (0, 0)),               # [Wq^T|Wk^T|Wv^T]
            pl.BlockSpec((T, T), lambda g: (0, 0)),                   # Wo^T
            pl.BlockSpec((KC_out, C_in), lambda g: (0, 0)),           # stacked conv taps
            pl.BlockSpec((C_out, 1), lambda g: (0, 0)),               # conv bias
        ],
        out_specs=pl.BlockSpec((Bt, C_out, T), lambda g: (g, 0, 0)),
        compiler_params=pltpu.CompilerParams(
            dimension_semantics=("parallel",)),
    )(x, wqkv_t, wo_t, w_taps, cb)


def reference_forward(x, wq, wk, wv, wo, conv_w, conv_b, K):
    """Pure-JAX re-implementation of the PyTorch forward for verification."""
    B, C, T = x.shape
    q = jnp.einsum('bct,jt->bcj', x, wq)
    k = jnp.einsum('bct,jt->bcj', x, wk)
    v = jnp.einsum('bct,jt->bcj', x, wv)
    kn = k / jnp.maximum(jnp.linalg.norm(k, axis=1, keepdims=True), 1e-12)
    qn = q / jnp.maximum(jnp.linalg.norm(q, axis=1, keepdims=True), 1e-12)
    sim = jnp.clip(jnp.einsum('bct,bcs->bts', kn, qn), 0.0, None)
    _, idx = lax.top_k(sim, K)                                        # (B, T, K)
    idx_e = jnp.broadcast_to(idx[:, None, :, :], (B, C, T, K))
    v_e = jnp.broadcast_to(v[:, :, None, :], (B, C, T, T))
    prime = jnp.take_along_axis(v_e, idx_e, axis=3)                   # (B, C, T, K)
    y = jnp.einsum('ock,bctk->bot', conv_w, prime) + conv_b[None, :, None]
    return jnp.einsum('bot,jt->boj', y, wo)


if __name__ == "__main__":
    # Module config: in_channels=4, out_channels=8, K=stride=3, sampling_type='all',
    # num_samples=-1, shuffle_pattern='NA', num_tokens=16, magnitude_type='similarity'
    B, C_in, C_out, T, K = 4, 4, 8, 16, 3

    key = jax.random.PRNGKey(0)
    kx, kq, kk_, kv, ko, kw, kb = jax.random.split(key, 7)
    # Positive x / Wq / Wk keep the similarity matrix away from clamp ties and
    # near-degenerate top-k boundaries, so the kernel-vs-reference comparison is
    # deterministic (torch.topk tie order is unspecified anyway).
    x = jax.random.uniform(kx, (B, C_in, T), jnp.float32, 0.1, 1.1)
    wq = jax.random.uniform(kq, (T, T), jnp.float32, 0.02, 0.30)      # nn.Linear(T, T)
    wk = jax.random.uniform(kk_, (T, T), jnp.float32, 0.02, 0.30)
    wv = jax.random.normal(kv, (T, T), jnp.float32) * 0.1
    wo = jax.random.normal(ko, (T, T), jnp.float32) * 0.1
    conv_w = jax.random.normal(kw, (C_out, C_in, K), jnp.float32) * 0.1
    conv_b = jax.random.normal(kb, (C_out,), jnp.float32) * 0.1

    # One-time weight preparation (hoisted out of the per-call path).
    wqkv_t, wo_t, w_taps, cb = prepare_params(wq, wk, wv, wo, conv_w, conv_b)

    out = conv1d_nn_attn(x, wqkv_t, wo_t, w_taps, cb, K)
    out = jax.block_until_ready(out)

    ref = reference_forward(x, wq, wk, wv, wo, conv_w, conv_b, K)
    assert out.shape == (B, C_out, T), out.shape
    max_err = float(jnp.max(jnp.abs(out - ref)))
    assert jnp.allclose(out, ref, atol=1e-4, rtol=1e-4), max_err

    print("KERNEL_OK")
</pallas_src>

<mosaic_0001>
module attributes {stable_mosaic.version = 11 : i64} {
  func.func @conv1d_nn_attn_kernel(%arg0: i32, %arg1: memref<2x4x16xf32, #tpu.memory_space<vmem>>, %arg2: memref<16x48xf32, #tpu.memory_space<vmem>>, %arg3: memref<16x16xf32, #tpu.memory_space<vmem>>, %arg4: memref<24x4xf32, #tpu.memory_space<vmem>>, %arg5: memref<8x1xf32, #tpu.memory_space<vmem>>, %arg6: memref<2x8x16xf32, #tpu.memory_space<vmem>>) attributes {dimension_semantics = [#tpu.dimension_semantics<parallel>], iteration_bounds = array<i64: 2>, scalar_prefetch = 0 : i64, scratch_operands = 0 : i64, tpu.core_type = #tpu.core_type<tc>, window_params = [{transform_indices = @transform_0, window_bounds = array<i64: 2, 4, 16>}, {pipeline_mode = #tpu.pipeline_mode<synchronous>, transform_indices = @transform_1, window_bounds = array<i64: 16, 48>}, {pipeline_mode = #tpu.pipeline_mode<synchronous>, transform_indices = @transform_2, window_bounds = array<i64: 16, 16>}, {pipeline_mode = #tpu.pipeline_mode<synchronous>, transform_indices = @transform_3, window_bounds = array<i64: 24, 4>}, {pipeline_mode = #tpu.pipeline_mode<synchronous>, transform_indices = @transform_4, window_bounds = array<i64: 8, 1>}, {transform_indices = @transform_5, window_bounds = array<i64: 2, 8, 16>}]} {
    %c0 = arith.constant 0 : index
    %c0_0 = arith.constant 0 : index
    %c0_1 = arith.constant 0 : index
    %0 = vector.load %arg1[%c0, %c0_0, %c0_1] : memref<2x4x16xf32, #tpu.memory_space<vmem>>, vector<2x4x16xf32>
    %c0_2 = arith.constant 0 : index
    %c0_3 = arith.constant 0 : index
    %1 = vector.load %arg2[%c0_2, %c0_3] : memref<16x48xf32, #tpu.memory_space<vmem>>, vector<16x48xf32>
    %2 = vector.shape_cast %1 : vector<16x48xf32> to vector<1x16x48xf32>
    %3 = vector.shape_cast %2 : vector<1x16x48xf32> to vector<1x16x48xf32>
    %4 = vector.broadcast %3 : vector<1x16x48xf32> to vector<2x16x48xf32>
    "tpu.trace_start"() <{level = 10 : i32, message = "bct,btu->bcu"}> : () -> ()
    %cst = arith.constant dense<0.000000e+00> : vector<2x4x48xf32>
    %5 = tpu.matmul %0, %4, %cst {dimension_numbers = #tpu.dot_dimension_numbers<[2], [1], [1], [2], [0, 0, 0, 1, 1, 2], [0], [0]>} : vector<2x4x16xf32>, vector<2x16x48xf32>, vector<2x4x48xf32> -> vector<2x4x48xf32>
    "tpu.trace_stop"() : () -> ()
    %6 = vector.extract_strided_slice %5 {offsets = [0, 0, 0], sizes = [2, 4, 16], strides = [1, 1, 1]} : vector<2x4x48xf32> to vector<2x4x16xf32>
    %7 = vector.extract_strided_slice %5 {offsets = [0, 0, 16], sizes = [2, 4, 16], strides = [1, 1, 1]} : vector<2x4x48xf32> to vector<2x4x16xf32>
    %8 = vector.extract_strided_slice %5 {offsets = [0, 0, 32], sizes = [2, 4, 16], strides = [1, 1, 1]} : vector<2x4x48xf32> to vector<2x4x16xf32>
    %9 = tpu.transpose %7, [0, 2, 1] : vector<2x4x16xf32> -> vector<2x16x4xf32>
    %10 = arith.mulf %9, %9 : vector<2x16x4xf32>
    %cst_4 = arith.constant dense<0.000000e+00> : vector<2x16xf32>
    %11 = vector.multi_reduction <add>, %10, %cst_4 [2] : vector<2x16x4xf32> to vector<2x16xf32>
    %12 = vector.shape_cast %11 : vector<2x16xf32> to vector<2x16x1xf32>
    %cst_5 = arith.constant 1.000000e-24 : f32
    %13 = vector.broadcast %cst_5 : f32 to vector<2x16x1xf32>
    %14 = arith.maximumf %12, %13 : vector<2x16x1xf32>
    %15 = math.rsqrt %14 : vector<2x16x1xf32>
    %16 = vector.broadcast %15 : vector<2x16x1xf32> to vector<2x16x4xf32>
    %17 = arith.mulf %9, %16 : vector<2x16x4xf32>
    %18 = arith.mulf %6, %6 : vector<2x4x16xf32>
    %cst_6 = arith.constant dense<0.000000e+00> : vector<2x16xf32>
    %19 = vector.multi_reduction <add>, %18, %cst_6 [1] : vector<2x4x16xf32> to vector<2x16xf32>
    %20 = vector.shape_cast %19 : vector<2x16xf32> to vector<2x1x16xf32>
    %cst_7 = arith.constant 1.000000e-24 : f32
    %21 = vector.broadcast %cst_7 : f32 to vector<2x1x16xf32>
    %22 = arith.maximumf %20, %21 : vector<2x1x16xf32>
    %23 = math.rsqrt %22 : vector<2x1x16xf32>
    %24 = vector.broadcast %23 : vector<2x1x16xf32> to vector<2x4x16xf32>
    %25 = arith.mulf %6, %24 : vector<2x4x16xf32>
    "tpu.trace_start"() <{level = 10 : i32, message = "btc,bcs->bts"}> : () -> ()
    %cst_8 = arith.constant dense<0.000000e+00> : vector<2x16x16xf32>
    %26 = tpu.matmul %17, %25, %cst_8 {dimension_numbers = #tpu.dot_dimension_numbers<[2], [1], [1], [2], [0, 0, 0, 1, 1, 2], [0], [0]>} : vector<2x16x4xf32>, vector<2x4x16xf32>, vector<2x16x16xf32> -> vector<2x16x16xf32>
    "tpu.trace_stop"() : () -> ()
    %cst_9 = arith.constant 0.000000e+00 : f32
    %27 = vector.broadcast %cst_9 : f32 to vector<2x16x16xf32>
    %28 = arith.maximumf %26, %27 : vector<2x16x16xf32>
    %c0_10 = arith.constant 0 : index
    %c0_11 = arith.constant 0 : index
    %29 = vector.load %arg4[%c0_10, %c0_11] : memref<24x4xf32, #tpu.memory_space<vmem>>, vector<24x4xf32>
    %30 = vector.shape_cast %29 : vector<24x4xf32> to vector<1x24x4xf32>
    %31 = vector.shape_cast %30 : vector<1x24x4xf32> to vector<1x24x4xf32>
    %32 = vector.broadcast %31 : vector<1x24x4xf32> to vector<2x24x4xf32>
    "tpu.trace_start"() <{level = 10 : i32, message = "bmc,bcj->bmj"}> : () -> ()
    %cst_12 = arith.constant dense<0.000000e+00> : vector<2x24x16xf32>
    %33 = tpu.matmul %32, %8, %cst_12 {dimension_numbers = #tpu.dot_dimension_numbers<[2], [1], [1], [2], [0, 0, 0, 1, 1, 2], [0], [0]>} : vector<2x24x4xf32>, vector<2x4x16xf32>, vector<2x24x16xf32> -> vector<2x24x16xf32>
    "tpu.trace_stop"() : () -> ()
    %34 = tpu.iota {dimensions = array<i32: 1>} : vector<2x16x16xi32>
    %35 = tpu.iota {dimensions = array<i32: 2>} : vector<2x16x16xi32>
    %36 = tpu.bitcast %28 : vector<2x16x16xf32> -> vector<2x16x16xi32>
    %c0_i32 = arith.constant 0 : i32
    %37 = vector.broadcast %c0_i32 : i32 to vector<2x16x16xi32>
    %38 = arith.maxsi %36, %37 : vector<2x16x16xi32>
    %c-16_i32 = arith.constant -16 : i32
    %39 = vector.broadcast %c-16_i32 : i32 to vector<2x16x16xi32>
    %40 = arith.andi %38, %39 : vector<2x16x16xi32>
    %c15_i32 = arith.constant 15 : i32
    %41 = vector.broadcast %c15_i32 : i32 to vector<2x16x16xi32>
    %42 = arith.subi %41, %35 : vector<2x16x16xi32>
    %43 = arith.ori %40, %42 : vector<2x16x16xi32>
    %c0_13 = arith.constant 0 : index
    %c0_14 = arith.constant 0 : index
    %44 = vector.load %arg5[%c0_13, %c0_14] : memref<8x1xf32, #tpu.memory_space<vmem>>, vector<8x1xf32>
    %45 = vector.shape_cast %44 : vector<8x1xf32> to vector<1x8x1xf32>
    %46 = vector.shape_cast %45 : vector<1x8x1xf32> to vector<1x8x1xf32>
    %47 = vector.broadcast %46 : vector<1x8x1xf32> to vector<2x8x16xf32>
    %cst_15 = arith.constant dense<-2147483648> : vector<2x16xi32>
    %48 = vector.multi_reduction <maxsi>, %43, %cst_15 [2] : vector<2x16x16xi32> to vector<2x16xi32>
    %c15_i32_16 = arith.constant 15 : i32
    %49 = vector.broadcast %c15_i32_16 : i32 to vector<2x16xi32>
    %50 = arith.andi %48, %49 : vector<2x16xi32>
    %c15_i32_17 = arith.constant 15 : i32
    %51 = vector.broadcast %c15_i32_17 : i32 to vector<2x16xi32>
    %52 = arith.subi %51, %50 : vector<2x16xi32>
    %53 = vector.shape_cast %52 : vector<2x16xi32> to vector<2x1x16xi32>
    %54 = vector.broadcast %53 : vector<2x1x16xi32> to vector<2x16x16xi32>
    %55 = arith.cmpi eq, %34, %54 : vector<2x16x16xi32>
    %56 = arith.extui %55 : vector<2x16x16xi1> to vector<2x16x16xi32>
    %57 = arith.sitofp %56 : vector<2x16x16xi32> to vector<2x16x16xf32>
    %58 = vector.extract_strided_slice %33 {offsets = [0, 0, 0], sizes = [2, 8, 16], strides = [1, 1, 1]} : vector<2x24x16xf32> to vector<2x8x16xf32>
    "tpu.trace_start"() <{level = 10 : i32, message = "boj,bjt->bot"}> : () -> ()
    %cst_18 = arith.constant dense<0.000000e+00> : vector<2x8x16xf32>
    %59 = tpu.matmul %58, %57, %cst_18 {dimension_numbers = #tpu.dot_dimension_numbers<[2], [1], [1], [2], [0, 0, 0, 1, 1, 2], [0], [0]>} : vector<2x8x16xf32>, vector<2x16x16xf32>, vector<2x8x16xf32> -> vector<2x8x16xf32>
    "tpu.trace_stop"() : () -> ()
    %60 = arith.addf %47, %59 : vector<2x8x16xf32>
    %61 = vector.shape_cast %52 : vector<2x16xi32> to vector<2x16x1xi32>
    %62 = vector.broadcast %61 : vector<2x16x1xi32> to vector<2x16x16xi32>
    %63 = arith.cmpi eq, %35, %62 : vector<2x16x16xi32>
    %c-1_i32 = arith.constant -1 : i32
    %64 = vector.broadcast %c-1_i32 : i32 to vector<2x16x16xi32>
    %65 = arith.select %63, %64, %43 : vector<2x16x16xi1>, vector<2x16x16xi32>
    %cst_19 = arith.constant dense<-2147483648> : vector<2x16xi32>
    %66 = vector.multi_reduction <maxsi>, %65, %cst_19 [2] : vector<2x16x16xi32> to vector<2x16xi32>
    %c15_i32_20 = arith.constant 15 : i32
    %67 = vector.broadcast %c15_i32_20 : i32 to vector<2x16xi32>
    %68 = arith.andi %66, %67 : vector<2x16xi32>
    %c15_i32_21 = arith.constant 15 : i32
    %69 = vector.broadcast %c15_i32_21 : i32 to vector<2x16xi32>
    %70 = arith.subi %69, %68 : vector<2x16xi32>
    %71 = vector.shape_cast %70 : vector<2x16xi32> to vector<2x1x16xi32>
    %72 = vector.broadcast %71 : vector<2x1x16xi32> to vector<2x16x16xi32>
    %73 = arith.cmpi eq, %34, %72 : vector<2x16x16xi32>
    %74 = arith.extui %73 : vector<2x16x16xi1> to vector<2x16x16xi32>
    %75 = arith.sitofp %74 : vector<2x16x16xi32> to vector<2x16x16xf32>
    %76 = vector.extract_strided_slice %33 {offsets = [0, 8, 0], sizes = [2, 8, 16], strides = [1, 1, 1]} : vector<2x24x16xf32> to vector<2x8x16xf32>
    "tpu.trace_start"() <{level = 10 : i32, message = "boj,bjt->bot"}> : () -> ()
    %cst_22 = arith.constant dense<0.000000e+00> : vector<2x8x16xf32>
    %77 = tpu.matmul %76, %75, %cst_22 {dimension_numbers = #tpu.dot_dimension_numbers<[2], [1], [1], [2], [0, 0, 0, 1, 1, 2], [0], [0]>} : vector<2x8x16xf32>, vector<2x16x16xf32>, vector<2x8x16xf32> -> vector<2x8x16xf32>
    "tpu.trace_stop"() : () -> ()
    %78 = arith.addf %60, %77 : vector<2x8x16xf32>
    %79 = vector.shape_cast %70 : vector<2x16xi32> to vector<2x16x1xi32>
    %80 = vector.broadcast %79 : vector<2x16x1xi32> to vector<2x16x16xi32>
    %81 = arith.cmpi eq, %35, %80 : vector<2x16x16xi32>
    %c-1_i32_23 = arith.constant -1 : i32
    %82 = vector.broadcast %c-1_i32_23 : i32 to vector<2x16x16xi32>
    %83 = arith.select %81, %82, %65 : vector<2x16x16xi1>, vector<2x16x16xi32>
    %cst_24 = arith.constant dense<-2147483648> : vector<2x16xi32>
    %84 = vector.multi_reduction <maxsi>, %83, %cst_24 [2] : vector<2x16x16xi32> to vector<2x16xi32>
    %c15_i32_25 = arith.constant 15 : i32
    %85 = vector.broadcast %c15_i32_25 : i32 to vector<2x16xi32>
    %86 = arith.andi %84, %85 : vector<2x16xi32>
    %c15_i32_26 = arith.constant 15 : i32
    %87 = vector.broadcast %c15_i32_26 : i32 to vector<2x16xi32>
    %88 = arith.subi %87, %86 : vector<2x16xi32>
    %89 = vector.shape_cast %88 : vector<2x16xi32> to vector<2x1x16xi32>
    %90 = vector.broadcast %89 : vector<2x1x16xi32> to vector<2x16x16xi32>
    %91 = arith.cmpi eq, %34, %90 : vector<2x16x16xi32>
    %92 = arith.extui %91 : vector<2x16x16xi1> to vector<2x16x16xi32>
    %93 = arith.sitofp %92 : vector<2x16x16xi32> to vector<2x16x16xf32>
    %94 = vector.extract_strided_slice %33 {offsets = [0, 16, 0], sizes = [2, 8, 16], strides = [1, 1, 1]} : vector<2x24x16xf32> to vector<2x8x16xf32>
    "tpu.trace_start"() <{level = 10 : i32, message = "boj,bjt->bot"}> : () -> ()
    %cst_27 = arith.constant dense<0.000000e+00> : vector<2x8x16xf32>
    %95 = tpu.matmul %94, %93, %cst_27 {dimension_numbers = #tpu.dot_dimension_numbers<[2], [1], [1], [2], [0, 0, 0, 1, 1, 2], [0], [0]>} : vector<2x8x16xf32>, vector<2x16x16xf32>, vector<2x8x16xf32> -> vector<2x8x16xf32>
    "tpu.trace_stop"() : () -> ()
    %96 = arith.addf %78, %95 : vector<2x8x16xf32>
    %c0_28 = arith.constant 0 : index
    %c0_29 = arith.constant 0 : index
    %97 = vector.load %arg3[%c0_28, %c0_29] : memref<16x16xf32, #tpu.memory_space<vmem>>, vector<16x16xf32>
    %98 = vector.shape_cast %97 : vector<16x16xf32> to vector<1x16x16xf32>
    %99 = vector.shape_cast %98 : vector<1x16x16xf32> to vector<1x16x16xf32>
    %100 = vector.broadcast %99 : vector<1x16x16xf32> to vector<2x16x16xf32>
    "tpu.trace_start"() <{level = 10 : i32, message = "bot,btj->boj"}> : () -> ()
    %cst_30 = arith.constant dense<0.000000e+00> : vector<2x8x16xf32>
    %101 = tpu.matmul %96, %100, %cst_30 {dimension_numbers = #tpu.dot_dimension_numbers<[2], [1], [1], [2], [0, 0, 0, 1, 1, 2], [0], [0]>} : vector<2x8x16xf32>, vector<2x16x16xf32>, vector<2x8x16xf32> -> vector<2x8x16xf32>
    "tpu.trace_stop"() : () -> ()
    %c0_31 = arith.constant 0 : index
    %c0_32 = arith.constant 0 : index
    %c0_33 = arith.constant 0 : index
    %102 = vector.load %arg6[%c0_31, %c0_32, %c0_33] : memref<2x8x16xf32, #tpu.memory_space<vmem>>, vector<2x8x16xf32>
    tpu.vector_store %arg6[%c0_31, %c0_32, %c0_33], %101 {strides = array<i32>} : memref<2x8x16xf32, #tpu.memory_space<vmem>>, vector<2x8x16xf32>,
    return
  }
  func.func @transform_0(%arg0: i32) -> (i32, i32, i32) {
    %c0_i32 = arith.constant 0 : i32
    %c0_i32_0 = arith.constant 0 : i32
    %c0_i32_1 = arith.constant 0 : i32
    return %arg0, %c0_i32, %c0_i32_0 : i32, i32, i32
  }
  func.func @transform_1(%arg0: i32) -> (i32, i32) {
    %c0_i32 = arith.constant 0 : i32
    %c0_i32_0 = arith.constant 0 : i32
    %c0_i32_1 = arith.constant 0 : i32
    return %c0_i32, %c0_i32_0 : i32, i32
  }
  func.func @transform_2(%arg0: i32) -> (i32, i32) {
    %c0_i32 = arith.constant 0 : i32
    %c0_i32_0 = arith.constant 0 : i32
    %c0_i32_1 = arith.constant 0 : i32
    return %c0_i32, %c0_i32_0 : i32, i32
  }
  func.func @transform_3(%arg0: i32) -> (i32, i32) {
    %c0_i32 = arith.constant 0 : i32
    %c0_i32_0 = arith.constant 0 : i32
    %c0_i32_1 = arith.constant 0 : i32
    return %c0_i32, %c0_i32_0 : i32, i32
  }
  func.func @transform_4(%arg0: i32) -> (i32, i32) {
    %c0_i32 = arith.constant 0 : i32
    %c0_i32_0 = arith.constant 0 : i32
    %c0_i32_1 = arith.constant 0 : i32
    return %c0_i32, %c0_i32_0 : i32, i32
  }
  func.func @transform_5(%arg0: i32) -> (i32, i32, i32) {
    %c0_i32 = arith.constant 0 : i32
    %c0_i32_0 = arith.constant 0 : i32
    %c0_i32_1 = arith.constant 0 : i32
    return %arg0, %c0_i32, %c0_i32_0 : i32, i32, i32
  }
}

</mosaic_0001>

<bundles_post_ra>
// kernel: tpu_custom_call.1
= control target key start
LH: loop header
LB: loop body
LE: loop exit
PB: predicated region body
PF: predicated region fallthrough
CT: control target
= control target key end

     0   :  { %10 = vsyncpa [#allocation3], 0  ;;  %s1803_s0 = inlined_call_operand.vmem [shape: f32[4,4,16], index: 0, kind: input, shape index: {}]   ;;  %s1804_s1 = inlined_call_operand.vmem [shape: f32[16,48], index: 1, kind: input, shape index: {}]   ;;  %s1805_s2 = inlined_call_operand.hbm [shape: f32[16,16], index: 2, kind: input, shape index: {}]   ;;  %s1806_s3 = inlined_call_operand.vmem [shape: f32[24,4], index: 3, kind: input, shape index: {}]   ;;  %s1807_s4 = inlined_call_operand.vmem [shape: f32[8,1], index: 4, kind: input, shape index: {}]   ;;  %s1808_s5 = inlined_call_operand.hbm [shape: f32[4,8,16], index: 5, kind: output, shape index: {}]  }
   0x1   :  { %11 = vsyncpa [#allocation4], 0 }
   0x2   :  { %13 = vsyncpa [#allocation4 + $0x1], 0  ;;  %s1519_s18 = smov 0   ;;  %s1521_s19 = smov 0  }
   0x3   :  { %s1523_s20 = smov 0   ;;  %s1525_s21 = smov 0  }
   0x4 LB: > { %s1540_s22 = sadd.s32 4294967295, %s1478_s21   ;;  %s1247_s23 = sadd.s32 4294967294, %s1478_s21   ;;  %s1478_s21 = sphi %s1525_s21, %s1814_s21   ;;  %s1474_s20 = sphi %s1523_s20, %s1813_s20   ;;  %s1470_s19 = sphi %s1521_s19, %s1812_s19   ;;  %s1466_s18 = sphi %s1519_s18, %s1811_s18  }
   0x5   : > { %s1544_s24 = sadd.s32 1, %s1478_s21   ;;  %s136_s25 = sadd.s32 1, %s1474_s20 }
   0x6   : > { %s133_s26 = ssub.s32 %s1478_s21, %s1544_s24  ;;  %p146_p0 = scmp.ne.s32.totalorder %s1474_s20, %s1470_s19 }
   0x7   : > { %p134_p1 = scmp.eq.s32.totalorder %s133_s26, 0  ;;  %p147_p2 = scmp.eq.s32.totalorder %s1540_s22, 1 }
   0x8   : > { %p152_p3 = scmp.ne.s32.totalorder %s1470_s19, %s1466_s18  ;;  %p153_p4 = scmp.eq.s32.totalorder %s1247_s23, 1 }
   0x9   : > { %s1555_s27 = scalar_select %p134_p1, %s1474_s20, %s136_s25  }
   0xa   : > { %p1557_p5 = por %p147_p2, %p146_p0  ;;  %p1561_p6 = por %p153_p4, %p152_p3 }
   0xb   : > { %p1248_p7 = scmp.ge.s32.totalorder %s1478_s21, 1  ;;  %p160_p8 = scmp.lt.s32.totalorder %s1478_s21, 3 }
   0xc   : > { %p1324_p9 = scmp.eq.s32.totalorder %s1540_s22, 0  ;;  %s174_s7 = sshll.u32 %s1805_s2, 4  ;;  %s175_s7 = int_to_ptr.hbm [resolvable:$true] %s174_s7 }
   0xd   : > { %p161_p10 = pnand %p1248_p7, %p160_p8  ;;  %s1480_s8 = smov [#allocation2]  }
   0xe   : > { %s176_s9 = sshll.u32 %s1480_s8, 4  ;;  %s1481_s10 = smov 128   ;;  %s177_s9 = int_to_ptr.vmem [resolvable:$true] %s176_s9 }
   0xf   : > { %p1316_p11 = pneg %p161_p10  ;;  %s1482_s11 = smov 8  }
  0x10   : > { %207 = sbr.rel (%p161_p10) target bundleno = 1764 (0x6e4), region = 40 }
  0x11   : > { %p1317_p12 = pnand %p1324_p9, %p1316_p11 }
  0x13   : > { %1319 = dma.hbm_to_vmem [thread:$0]  (!%p1317_p12), %s175_s7, 256, %s177_s9, [#allocation3], %s1481_s10, %s1481_s10, %s1482_s11  }
  0x15   : > { %1457 = dma.done.wait (%p1324_p9), [#allocation3], 256  }
  0x16   : > { %1459 = vsyncadd (%p1324_p9), [#allocation3], 4294967040  ;;  %s1254_s12 = sshll.u32 %s1540_s22, 1  ;;  %v246_v0 = vld [vmem:[%s1804_s1 + $0x8] sm:$0xff]  ;;  %v245_v1 = vld [vmem:[%s1804_s1] sm:$0xff]  ;;  %vm247_vm0 = vcmask 130048  }
  0x17   : > { %p237_p13 = scmp.lt.s32.totalorder %s1254_s12, 3  ;;  %265 = vmatpush.msra.mxu0 %v246_v0  ;;  %288 = vmatpush.msra.mxu1 %v246_v0  ;;  %vm433_vm1 = vcmask 125952   ;;  %s1483_s30 = smov 112   ;;  %vm478_vm7 = vcmask 1043456   ;;  %vm370_vm9 = vcmask 31744  }
  0x18   : > { %s1485_s6 = smov 96   ;;  %s233_s15 = sand.u32 1, %s1470_s19  }
  0x19   : > { %s1816_s12 = smov (!%p237_p13, %s1254_s12), 3  ;;  %266 = vmatpush.msra.mxu0 %v245_v1  ;;  %289 = vmatpush.msra.mxu1 %v245_v1  ;;  %s1309_s17 = sshll.u32 %s1540_s22, 4 }
  0x1a   : > { %s1255_s13 = sshll.u32 %s1816_s12, 2  ;;  %s1158_s8 = scalar_lea.sflag [#allocation4], %s233_s15 }
  0x1b   : > { %s240_s16 = scalar_lea.vmem %s1803_s0, %s1255_s13  ;;  %s1432_s12 = scalar_lea.hbm %s1808_s5, 32 }
  0x1c   : > { %v243_v2 = vld [vmem:[%s240_s16] sm:$0xf]  ;;  %v244_v3 = vld [vmem:[%s240_s16 + $0x4] sm:$0xf]  ;;  %s1253_s16 = sshll.u32 %s233_s15, 4 }
  0x1d   : > { %1256 = vmatmul.msk.f32.vlgmr.msra.gmra.mxu0 %vm247_vm0, %v243_v2  ;;  %1257 = vmatmul.msk.f32.vlgmr.msra.gmra.mxu1 %vm247_vm0, %v244_v3  ;;  %s235_s23 = scalar_lea.vmem [#allocation5], %s1253_s16 }
  0x9a   : > { %v1589_v4 = vpop.f32.mrf.mxu0  ;;  %v1591_v5 = vpop.f32.mrf.mxu1 }
  0x9b   : > { %v431_v6 = vmul.f32 %v1589_v4, %v1589_v4  ;;  %v432_v7 = vmul.f32 %v1591_v5, %v1591_v5  ;;  %296 = vrot.lane.b32.xlu0 %v1589_v4, %s1483_s30 }
  0x9d   : > { %v434_v8 = vsel %vm433_vm1, %v431_v6, 0.0  ;;  %v441_v9 = vsel %vm433_vm1, %v432_v7, 0.0 }
  0x9e   : > { %v435_v10 = vrot.slane %v434_v8, 4  ;;  %v442_v11 = vrot.slane %v441_v9, 4 }
  0xa0   : > { %v436_v12 = vadd.f32 %v435_v10, %v434_v8  ;;  %v443_v13 = vadd.f32 %v442_v11, %v441_v9 }
  0xa2   : > { %v437_v14 = vrot.slane %v436_v12, 2  ;;  %v444_v15 = vrot.slane %v443_v13, 2 }
  0xa3   : > { %298 = vrot.lane.b32.xlu0 %v1591_v5, %s1483_s30  ;;  %s1169_s30 = scalar_lea.hbm %s1808_s5, %s1309_s17 }
  0xa4   : > { %v438_v16 = vadd.f32 %v437_v14, %v436_v12  ;;  %v445_v17 = vadd.f32 %v444_v15, %v443_v13  ;;  %s1172_s7 = sshll.u32 %s1169_s30, 4  ;;  %s1173_s7 = int_to_ptr.hbm [resolvable:$true] %s1172_s7 }
  0xa5   : > { %s1426_s9 = sshra.s32 %s1173_s7, 4  ;;  %s1427_s9 = int_to_ptr.hbm [resolvable:$true] %s1426_s9 }
  0xa6   : > { %v439_v18 = vrot.slane %v438_v16, 1  ;;  %v446_v19 = vrot.slane %v445_v17, 1  ;;  %s1428_s22 = scalar_lea.hbm %s1427_s9, 16  ;;  %p1433_p3 = scmp.lt.s32.totalorder %s1427_s9, %s1808_s5 }
  0xa7   : > { %p1429_p0 = scmp.ne.s32.totalorder %s1427_s9, %s1428_s22  ;;  %p1434_p4 = scmp.lt.s32.totalorder %s1432_s12, %s1428_s22 }
  0xa8   : > { %v440_v20 = vadd.f32 %v439_v18, %v438_v16  ;;  %v447_v21 = vadd.f32 %v446_v19, %v445_v17 }
  0xa9   : > { %p1430_p1 = pnand %p1429_p0, %p1557_p5  ;;  %p1435_p7 = por %p1434_p4, %p1433_p3 }
  0xaa   : > { %v448_v22 = vmax.f32 %v440_v20, 1e-24  ;;  %v449_v23 = vmax.f32 %v447_v21, 1e-24 }
  0xab   : > { %p1431_p2 = pneg %p1430_p1 }
  0xac   : > { %1370 = vrsqrt.f32 %v448_v22  ;;  %vm466_vm3 = vweird.f32 %v449_v23  ;;  %vm456_vm5 = vweird.f32 %v448_v22 }
  0xad   : > { %1372 = vrsqrt.f32 %v449_v23  ;;  %p1436_p8 = pnand %p1435_p7, %p1431_p2 }
  0xb2   : > { %v1371_v24 = vpop.eup %1370 }
  0xb3   : > { %v1373_v25 = vpop.eup %1372  ;;  %v451_v26 = vmul.f32 %v1371_v24, %v448_v22  ;;  %vm457_vm2 = vweird.f32 %v1371_v24 }
  0xb4   : > { %v461_v27 = vmul.f32 %v1373_v25, %v449_v23  ;;  %vm467_vm4 = vweird.f32 %v1373_v25  ;;  %vm458_vm6 = vmor %vm456_vm5, %vm457_vm2 }
  0xb5   : > { %v452_v28 = vmul.f32 %v1371_v24, %v451_v26  ;;  %vm468_vm8 = vmor %vm466_vm3, %vm467_vm4 }
  0xb6   : > { %v462_v29 = vmul.f32 %v1373_v25, %v461_v27 }
  0xb7   : > { %v453_v30 = vmul.f32 0.5, %v452_v28 }
  0xb8   : > { %v463_v31 = vmul.f32 0.5, %v462_v29 }
  0xb9   : > { %v454_v32 = vsub.f32 1.5, %v453_v30 }
  0xba   : > { %v464_v33 = vsub.f32 1.5, %v463_v31 }
  0xbb   : > { %v455_v34 = vmul.f32 %v1371_v24, %v454_v32  ;;  %v613_v32 = vlaneseq }
  0xbc   : > { %v465_v35 = vmul.f32 %v1373_v25, %v464_v33 }
  0xbd   : > { %v459_v36 = vsel %vm458_vm6, %v1371_v24, %v455_v34  ;;  %v1617_v33 = vand.u32 127, %v613_v32 }
  0xbe   : > { %v470_v37 = vmul.f32 %v459_v36, %v1589_v4  ;;  %v469_v38 = vsel %vm468_vm8, %v1373_v25, %v465_v35 }
  0xbf   : > { %v471_v39 = vmul.f32 %v469_v38, %v1591_v5  ;;  %v634_v36 = vsub.s32 15, %v1617_v33 }
  0xc0   : > { %1258 = vmatpush.msk.msra.mxu2 %vm478_vm7, %v470_v37 }
  0xc1   : > { %1261 = vmatpush.msk.msra.mxu3 %vm478_vm7, %v471_v39 }
 0x10d   : > { %v297_v40 = vpop.permute.xlu0 %296 }
 0x10e   : > { %302 = vxpose.xlu1.b32.start.end [1/1] (short) (narrow) %v297_v40, 16 }
 0x115   : > { %v299_v41 = vpop.permute.xlu0 %298 }
 0x11e   : > { %334 = vxpose.xlu1.b32.start.end [1/1] (short) (narrow) %v299_v41, 16 }
 0x1b2   : > { %v318_v42 = vpop.trf.xlu1 }
 0x1b3   : > { %v366_v43 = vmul.f32 %v318_v42, %v318_v42 }
 0x1b5   : > { %v371_v44 = vsel %vm370_vm9, %v366_v43, 0.0 }
 0x1b6   : > { %372 = vadd.xlane.f32.xlu2 %v371_v44 }
 0x1ba   : > { %v319_v45 = vpop.trf.xlu1 }
 0x1bb   : > { %v367_v46 = vmul.f32 %v319_v45, %v319_v45 }
 0x1bd   : > { %v374_v47 = vsel %vm370_vm9, %v367_v46, 0.0 }
 0x1be   : > { %375 = vadd.xlane.f32.xlu0 %v374_v47 }
 0x1c2   : > { %v350_v48 = vpop.trf.xlu1 }
 0x1c3   : > { %v368_v49 = vmul.f32 %v350_v48, %v350_v48 }
 0x1c5   : > { %v377_v50 = vsel %vm370_vm9, %v368_v49, 0.0 }
 0x1c6   : > { %378 = vadd.xlane.f32.xlu2 %v377_v50 }
 0x1ca   : > { %v1606_v51 = vpop.trf.xlu1 }
 0x1cb   : > { %v369_v52 = vmul.f32 %v1606_v51, %v1606_v51 }
 0x1cd   : > { %v380_v53 = vsel %vm370_vm9, %v369_v52, 0.0 }
 0x1ce   : > { %381 = vadd.xlane.f32.xlu2 %v380_v53 }
 0x229   : > { %v373_v54 = vpop.xlane.xlu2 %372 }
 0x22a   : > { %v383_v55 = vmax.f32 %v373_v54, 1e-24 }
 0x22c   : > { %1374 = vrsqrt.f32 %v383_v55  ;;  %vm393_vm11 = vweird.f32 %v383_v55 }
 0x231   : > { %v376_v56 = vpop.xlane.xlu0 %375 }
 0x232   : > { %v1375_v57 = vpop.eup %1374  ;;  %v384_v58 = vmax.f32 %v376_v56, 1e-24 }
 0x233   : > { %v388_v59 = vmul.f32 %v1375_v57, %v383_v55  ;;  %vm394_vm10 = vweird.f32 %v1375_v57 }
 0x234   : > { %1376 = vrsqrt.f32 %v384_v58  ;;  %vm395_vm12 = vmor %vm393_vm11, %vm394_vm10  ;;  %vm403_vm14 = vweird.f32 %v384_v58 }
 0x235   : > { %v389_v60 = vmul.f32 %v1375_v57, %v388_v59 }
 0x237   : > { %v390_v61 = vmul.f32 0.5, %v389_v60 }
 0x239   : > { %v391_v62 = vsub.f32 1.5, %v390_v61  ;;  %v379_v63 = vpop.xlane.xlu2 %378 }
 0x23a   : > { %v1377_v0 = vpop.eup %1376  ;;  %v385_v1 = vmax.f32 %v379_v63, 1e-24 }
 0x23b   : > { %v398_v2 = vmul.f32 %v1377_v0, %v384_v58  ;;  %v392_v3 = vmul.f32 %v1375_v57, %v391_v62  ;;  %vm404_vm13 = vweird.f32 %v1377_v0 }
 0x23c   : > { %1378 = vrsqrt.f32 %v385_v1  ;;  %vm405_vm15 = vmor %vm403_vm14, %vm404_vm13  ;;  %vm413_vm2 = vweird.f32 %v385_v1 }
 0x23d   : > { %v399_v6 = vmul.f32 %v1377_v0, %v398_v2  ;;  %v396_v7 = vsel %vm395_vm12, %v1375_v57, %v392_v3 }
 0x23e   : > { %v427_v8 = vmul.f32 %v396_v7, %v318_v42 }
 0x23f   : > { %v400_v9 = vmul.f32 0.5, %v399_v6 }
 0x240   : > { %1259 = vmatmul.msk.f32.vlgmr.msra.gmra.mxu2 %vm370_vm9, %v427_v8 }
 0x241   : > { %v401_v10 = vsub.f32 1.5, %v400_v9  ;;  %v382_v11 = vpop.xlane.xlu2 %381 }
 0x242   : > { %v1379_v12 = vpop.eup %1378  ;;  %v386_v13 = vmax.f32 %v382_v11, 1e-24 }
 0x243   : > { %v408_v14 = vmul.f32 %v1379_v12, %v385_v1  ;;  %v402_v15 = vmul.f32 %v1377_v0, %v401_v10  ;;  %vm414_vm1 = vweird.f32 %v1379_v12 }
 0x244   : > { %1380 = vrsqrt.f32 %v386_v13  ;;  %vm415_vm3 = vmor %vm413_vm2, %vm414_vm1  ;;  %vm423_vm4 = vweird.f32 %v386_v13 }
 0x245   : > { %v409_v16 = vmul.f32 %v1379_v12, %v408_v14  ;;  %v406_v17 = vsel %vm405_vm15, %v1377_v0, %v402_v15 }
 0x246   : > { %v428_v18 = vmul.f32 %v406_v17, %v319_v45 }
 0x247   : > { %v410_v19 = vmul.f32 0.5, %v409_v16 }
 0x248   : > { %1260 = vmatmul.msk.f32.gmra.mxu2 %vm370_vm9, %v428_v18 }
 0x249   : > { %v411_v20 = vsub.f32 1.5, %v410_v19 }
 0x24a   : > { %v1381_v21 = vpop.eup %1380 }
 0x24b   : > { %v418_v22 = vmul.f32 %v1381_v21, %v386_v13  ;;  %v412_v23 = vmul.f32 %v1379_v12, %v411_v20  ;;  %vm424_vm5 = vweird.f32 %v1381_v21 }
 0x24c   : > { %vm425_vm6 = vmor %vm423_vm4, %vm424_vm5  ;;  %vm716_vm4 = vcmask 130112  }
 0x24d   : > { %v419_v24 = vmul.f32 %v1381_v21, %v418_v22  ;;  %v416_v25 = vsel %vm415_vm3, %v1379_v12, %v412_v23 }
 0x24e   : > { %v429_v26 = vmul.f32 %v416_v25, %v350_v48 }
 0x24f   : > { %v420_v27 = vmul.f32 0.5, %v419_v24 }
 0x250   : > { %1262 = vmatmul.msk.f32.vlgmr.msra.gmra.mxu3 %vm370_vm9, %v429_v26 }
 0x251   : > { %v421_v28 = vsub.f32 1.5, %v420_v27 }
 0x253   : > { %v422_v29 = vmul.f32 %v1381_v21, %v421_v28 }
 0x255   : > { %v426_v30 = vsel %vm425_vm6, %v1381_v21, %v422_v29 }
 0x256   : > { %v430_v31 = vmul.f32 %v426_v30, %v1606_v51 }
 0x258   : > { %1263 = vmatmul.msk.f32.gmra.mxu3 %vm370_vm9, %v430_v31 }
 0x2c3   : > { %v499_v34 = vpop.f32.mrf.mxu2 }
 0x2c4   : > { %v537_v35 = vmax.f32 %v499_v34, 0.0 }
 0x2c6   : > { %vm622_vm8 = vcmp.gt.s32.totalorder %v537_v35, 0 }
 0x2c7   : > { %v623_v37 = vsel %vm622_vm8, %v537_v35, 0 }
 0x2c8   : > { %v630_v38 = vand.u32 4294967280, %v623_v37 }
 0x2ca   : > { %v1620_v39 = vor.u32 %v634_v36, %v630_v38 }
 0x2cb   : > { %v502_v40 = vpop.f32.mrf.mxu2 }
 0x2cc   : > { %v645_v41 = vsel %vm247_vm0, %v1620_v39, 2147483648  ;;  %v538_v43 = vmax.f32 %v502_v40, 0.0 }
 0x2cd   : > { %v647_v42 = vshra.s32 %v645_v41, 16  ;;  %v646_v3 = vand.u32 65535, %v645_v41 }
 0x2ce   : > { %vm624_vm10 = vcmp.gt.s32.totalorder %v538_v43, 0 }
 0x2cf   : > { %v649_v44 = vcvt.s32.f32 %v647_v42  ;;  %v625_v47 = vsel %vm624_vm10, %v538_v43, 0  ;;  %v648_v7 = vcvt.s32.f32 %v646_v3 }
 0x2d0   : > { %v631_v49 = vand.u32 4294967280, %v625_v47 }
 0x2d1   : > { %650 = vmax.xlane.f32.xlu1 %v649_v44 }
 0x2d2   : > { %v1626_v53 = vor.u32 %v634_v36, %v631_v49 }
 0x2d3   : > { %v531_v45 = vpop.f32.mrf.mxu3 }
 0x2d4   : > { %v539_v46 = vmax.f32 %v531_v45, 0.0  ;;  %v660_v60 = vsel %vm247_vm0, %v1626_v53, 2147483648 }
 0x2d5   : > { %v662_v61 = vshra.s32 %v660_v60, 16  ;;  %v661_v13 = vand.u32 65535, %v660_v60 }
 0x2d6   : > { %vm626_vm11 = vcmp.gt.s32.totalorder %v539_v46, 0 }
 0x2d7   : > { %v627_v48 = vsel %vm626_vm11, %v539_v46, 0  ;;  %v664_v63 = vcvt.s32.f32 %v662_v61  ;;  %v663_v15 = vcvt.s32.f32 %v661_v13 }
 0x2d8   : > { %v632_v50 = vand.u32 4294967280, %v627_v48 }
 0x2da   : > { %v1624_v51 = vor.u32 %v634_v36, %v632_v50  ;;  %v1655_v50 = vshrl.u32 %v613_v32, 7 }
 0x2db   : > { %v534_v52 = vpop.f32.mrf.mxu3 }
 0x2dc   : > { %v540_v54 = vmax.f32 %v534_v52, 0.0  ;;  %v675_v55 = vsel %vm247_vm0, %v1624_v51, 2147483648  ;;  %v1658_v52 = vadd.s32 4294967288, %v1617_v33 }
 0x2dd   : > { %v677_v56 = vshra.s32 %v675_v55, 16  ;;  %v676_v9 = vand.u32 65535, %v675_v55 }
 0x2de   : > { %vm628_vm12 = vcmp.gt.s32.totalorder %v540_v54, 0 }
 0x2df   : > { %v629_v57 = vsel %vm628_vm12, %v540_v54, 0  ;;  %v679_v58 = vcvt.s32.f32 %v677_v56  ;;  %v678_v11 = vcvt.s32.f32 %v676_v9 }
 0x2e0   : > { %v633_v59 = vand.u32 4294967280, %v629_v57 }
 0x2e1   : > { %680 = vmax.xlane.f32.xlu2 %v679_v58 }
 0x2e2   : > { %v1632_v62 = vor.u32 %v634_v36, %v633_v59 }
 0x2e4   : > { %v690_v0 = vsel %vm247_vm0, %v1632_v62, 2147483648 }
 0x2e5   : > { %v692_v1 = vshra.s32 %v690_v0, 16  ;;  %v691_v17 = vand.u32 65535, %v690_v0 }
 0x2e7   : > { %v694_v2 = vcvt.s32.f32 %v692_v1  ;;  %v693_v19 = vcvt.s32.f32 %v691_v17 }
 0x2e9   : > { %665 = vmax.xlane.f32.xlu2 %v664_v63 }
 0x2f1   : > { %695 = vmax.xlane.f32.xlu2 %v694_v2 }
 0x344   : > { %v651_v6 = vpop.xlane.xlu1 %650 }
 0x345   : > { %vm652_vm13 = vcmp.eq.f32.partialorder %v649_v44, %v651_v6  ;;  %v657_v21 = vcvt.f32.s32 %v651_v6  ;;  %v1484_v6 = vmov 1.0  }
 0x346   : > { %v653_v8 = vsel %vm652_vm13, %v648_v7, -inf }
 0x347   : > { %654 = vmax.xlane.f32.xlu2 %v653_v8  ;;  %v658_v23 = vshll.u32 %v657_v21, 16 }
 0x354   : > { %v681_v10 = vpop.xlane.xlu2 %680 }
 0x355   : > { %vm682_vm14 = vcmp.eq.f32.partialorder %v679_v58, %v681_v10  ;;  %v687_v31 = vcvt.f32.s32 %v681_v10 }
 0x356   : > { %v683_v12 = vsel %vm682_vm14, %v678_v11, -inf }
 0x357   : > { %684 = vmax.xlane.f32.xlu0 %v683_v12  ;;  %v688_v36 = vshll.u32 %v687_v31, 16 }
 0x35c   : > { %v666_v14 = vpop.xlane.xlu2 %665 }
 0x35d   : > { %vm667_vm15 = vcmp.eq.f32.partialorder %v664_v63, %v666_v14  ;;  %v672_v40 = vcvt.f32.s32 %v666_v14 }
 0x35e   : > { %v668_v16 = vsel %vm667_vm15, %v663_v15, -inf }
 0x35f   : > { %669 = vmax.xlane.f32.xlu2 %v668_v16  ;;  %v673_v43 = vshll.u32 %v672_v40, 16 }
 0x364   : > { %v696_v18 = vpop.xlane.xlu2 %695 }
 0x365   : > { %vm697_vm1 = vcmp.eq.f32.partialorder %v694_v2, %v696_v18  ;;  %v702_v48 = vcvt.f32.s32 %v696_v18 }
 0x366   : > { %v698_v20 = vsel %vm697_vm1, %v693_v19, -inf }
 0x367   : > { %699 = vmax.xlane.f32.xlu2 %v698_v20  ;;  %v703_v57 = vshll.u32 %v702_v48, 16 }
 0x3ba   : > { %v655_v22 = vpop.xlane.xlu2 %654 }
 0x3bb   : > { %v656_v24 = vcvt.f32.s32 %v655_v22 }
 0x3bd   : > { %v659_v25 = vadd.s32 %v658_v23, %v656_v24 }
 0x3bf   : > { %v705_v26 = vand.u32 15, %v659_v25 }
 0x3c1   : > { %v709_v27 = vsub.s32 15, %v705_v26 }
 0x3c3   : > { %vm799_vm2 = vcmp.eq.s32.totalorder %v1617_v33, %v709_v27  ;;  %v713_v59 = vperm.slane %v709_v27, %v1617_v33 }
 0x3c4   : > { %v1638_v28 = vsel %vm799_vm2, 4294967295, %v1620_v39 }
 0x3c5   : > { %v1642_v29 = vsel %vm247_vm0, %v1638_v28, 2147483648 }
 0x3c6   : > { %v809_v30 = vshra.s32 %v1642_v29, 16 }
 0x3c8   : > { %v1645_v34 = vcvt.s32.f32 %v809_v30 }
 0x3ca   : > { %v685_v35 = vpop.xlane.xlu0 %684  ;;  %812 = vmax.xlane.f32.xlu0 %v1645_v34 }
 0x3cb   : > { %v686_v37 = vcvt.f32.s32 %v685_v35 }
 0x3cd   : > { %v689_v38 = vadd.s32 %v688_v36, %v686_v37 }
 0x3cf   : > { %v707_v41 = vand.u32 15, %v689_v38 }
 0x3d1   : > { %v711_v42 = vsub.s32 15, %v707_v41 }
 0x3d2   : > { %v670_v39 = vpop.xlane.xlu2 %669 }
 0x3d3   : > { %v671_v44 = vcvt.f32.s32 %v670_v39  ;;  %vm801_vm3 = vcmp.eq.s32.totalorder %v1617_v33, %v711_v42 }
 0x3d4   : > { %v1650_v45 = vsel %vm801_vm3, 4294967295, %v1624_v51  ;;  %v1661_v51 = vadd.s32 8, %v1655_v50 }
 0x3d5   : > { %v674_v46 = vadd.s32 %v673_v43, %v671_v44  ;;  %v837_v47 = vsel %vm247_vm0, %v1650_v45, 2147483648 }
 0x3d6   : > { %v839_v49 = vshra.s32 %v837_v47, 16  ;;  %v838_v18 = vand.u32 65535, %v837_v47 }
 0x3d7   : > { %v706_v54 = vand.u32 15, %v674_v46 }
 0x3d8   : > { %v841_v55 = vcvt.s32.f32 %v839_v49  ;;  %v840_v20 = vcvt.s32.f32 %v838_v18 }
 0x3d9   : > { %v710_v56 = vsub.s32 15, %v706_v54 }
 0x3da   : > { %842 = vmax.xlane.f32.xlu0 %v841_v55  ;;  %v700_v58 = vpop.xlane.xlu2 %699 }
 0x3db   : > { %v715_v60 = vperm.slane %v710_v56, %v1658_v52  ;;  %v701_v61 = vcvt.f32.s32 %v700_v58  ;;  %vm800_vm5 = vcmp.eq.s32.totalorder %v1617_v33, %v710_v56 }
 0x3dc   : > { %v1667_v32 = vsel %vm800_vm5, 4294967295, %v1626_v53  ;;  %v718_v53 = vperm.slane %v711_v42, %v1617_v33 }
 0x3dd   : > { %v704_v63 = vadd.s32 %v703_v57, %v701_v61  ;;  %v717_v0 = vsel %vm716_vm4, %v715_v60, %v713_v59  ;;  %v822_v1 = vsel %vm247_vm0, %v1667_v32, 2147483648 }
 0x3de   : > { %vm740_vm6 = vcmp.eq.s32.totalorder %v1661_v51, %v717_v0  ;;  %v824_v2 = vshra.s32 %v822_v1, 16  ;;  %vm739_vm8 = vcmp.eq.s32.totalorder %v1655_v50, %v717_v0  ;;  %v823_v22 = vand.u32 65535, %v822_v1 }
 0x3df   : > { %v708_v3 = vand.u32 15, %v704_v63  ;;  %1276 = vmatpush.msk.msrb.mxu2 %vm740_vm6, %v1484_v6 }
 0x3e0   : > { %v826_v7 = vcvt.s32.f32 %v824_v2  ;;  %v825_v24 = vcvt.s32.f32 %v823_v22 }
 0x3e1   : > { %v712_v8 = vsub.s32 15, %v708_v3  ;;  %1277 = vmatpush.msk.msrb.mxu2 %vm739_vm8, %v1484_v6 }
 0x3e2   : > { %827 = vmax.xlane.f32.xlu2 %v826_v7 }
 0x3e3   : > { %v719_v9 = vperm.slane %v712_v8, %v1658_v52  ;;  %vm802_vm10 = vcmp.eq.s32.totalorder %v1617_v33, %v712_v8 }
 0x3e4   : > { %v1680_v10 = vsel %vm802_vm10, 4294967295, %v1632_v62  ;;  %v808_v62 = vand.u32 65535, %v1642_v29 }
 0x3e5   : > { %v720_v11 = vsel %vm716_vm4, %v719_v9, %v718_v53  ;;  %v852_v12 = vsel %vm247_vm0, %v1680_v10, 2147483648 }
 0x3e6   : > { %vm742_vm11 = vcmp.eq.s32.totalorder %v1661_v51, %v720_v11  ;;  %v854_v13 = vshra.s32 %v852_v12, 16  ;;  %vm741_vm12 = vcmp.eq.s32.totalorder %v1655_v50, %v720_v11  ;;  %v810_v16 = vcvt.s32.f32 %v808_v62 }
 0x3e7   : > { %1279 = vmatpush.msk.msrb.mxu3 %vm742_vm11, %v1484_v6 }
 0x3e8   : > { %v856_v14 = vcvt.s32.f32 %v854_v13 }
 0x3e9   : > { %1280 = vmatpush.msk.msrb.mxu3 %vm741_vm12, %v1484_v6 }
 0x3ea   : > { %857 = vmax.xlane.f32.xlu2 %v856_v14 }
 0x3ee   : > { %544 = vrot.lane.b32.xlu0 %v1589_v4, %s1485_s6 }
 0x402   : > { %583 = vrot.lane.b32.xlu2 %v1591_v5, %s1485_s6  ;;  %v853_v5 = vand.u32 65535, %v852_v12  ;;  %s1170_s6 = sshll.u32 %s235_s23, 4  ;;  %s1171_s6 = int_to_ptr.vmem [resolvable:$true] %s1170_s6 }
 0x404   : > { %v855_v26 = vcvt.s32.f32 %v853_v5 }
 0x43d   : > { %v813_v15 = vpop.xlane.xlu0 %812 }
 0x43e   : > { %vm814_vm13 = vcmp.eq.f32.partialorder %v1645_v34, %v813_v15  ;;  %v819_v31 = vcvt.f32.s32 %v813_v15 }
 0x43f   : > { %v815_v17 = vsel %vm814_vm13, %v810_v16, -inf }
 0x440   : > { %816 = vmax.xlane.f32.xlu0 %v815_v17  ;;  %v820_v35 = vshll.u32 %v819_v31, 16 }
 0x44d   : > { %v843_v19 = vpop.xlane.xlu0 %842 }
 0x44e   : > { %vm844_vm14 = vcmp.eq.f32.partialorder %v841_v55, %v843_v19  ;;  %v849_v43 = vcvt.f32.s32 %v843_v19 }
 0x44f   : > { %v845_v21 = vsel %vm844_vm14, %v840_v20, -inf }
 0x450   : > { %846 = vmax.xlane.f32.xlu1 %v845_v21  ;;  %v850_v47 = vshll.u32 %v849_v43, 16 }
 0x455   : > { %v828_v23 = vpop.xlane.xlu2 %827 }
 0x456   : > { %vm829_vm15 = vcmp.eq.f32.partialorder %v826_v7, %v828_v23  ;;  %v834_v54 = vcvt.f32.s32 %v828_v23 }
 0x457   : > { %v830_v4 = vsel %vm829_vm15, %v825_v24, -inf  ;;  %v541_v24 = vld [vmem:[%s1806_s3] sm:$0xff] }
 0x458   : > { %831 = vmax.xlane.f32.xlu2 %v830_v4  ;;  %v835_v58 = vshll.u32 %v834_v54, 16  ;;  %v639_v54 = vld [vmem:[%s1807_s4] sm:$0xff] }
 0x45d   : > { %v858_v25 = vpop.xlane.xlu2 %857 }
 0x45e   : > { %vm859_vm1 = vcmp.eq.f32.partialorder %v856_v14, %v858_v25  ;;  %v864_v63 = vcvt.f32.s32 %v858_v25 }
 0x45f   : > { %v860_v27 = vsel %vm859_vm1, %v855_v26, -inf  ;;  %v543_v26 = vld [vmem:[%s1806_s3 + $0x10] sm:$0xff] }
 0x460   : > { %v545_v29 = vpop.permute.xlu0 %544  ;;  %861 = vmax.xlane.f32.xlu1 %v860_v27  ;;  %v865_v7 = vshll.u32 %v864_v63, 16 }
 0x461   : > { %1264 = vmatpush.msk.msrb.mxu0 %vm478_vm7, %v545_v29 }
 0x462   : > { %1265 = vmatmul.msk.f32.vlgmr.msrb.gmra.mxu0 %vm370_vm9, %v541_v24 }
 0x465   : > { %v584_v30 = vpop.permute.xlu2 %583 }
 0x466   : > { %1268 = vmatpush.msk.msrb.mxu1 %vm478_vm7, %v584_v30 }
 0x467   : > { %1269 = vmatmul.msk.f32.vlgmr.msrb.gmra.mxu1 %vm370_vm9, %v541_v24 }
 0x4b3   : > { %v817_v34 = vpop.xlane.xlu0 %816 }
 0x4b4   : > { %v818_v36 = vcvt.f32.s32 %v817_v34 }
 0x4b6   : > { %v821_v37 = vadd.s32 %v820_v35, %v818_v36 }
 0x4b8   : > { %v867_v38 = vand.u32 15, %v821_v37 }
 0x4ba   : > { %v871_v40 = vsub.s32 15, %v867_v38 }
 0x4bc   : > { %vm953_vm2 = vcmp.eq.s32.totalorder %v1617_v33, %v871_v40  ;;  %v875_v53 = vperm.slane %v871_v40, %v1617_v33 }
 0x4bd   : > { %v957_v41 = vsel %vm953_vm2, 4294967295, %v1638_v28 }
 0x4be   : > { %v1698_v42 = vsel %vm247_vm0, %v957_v41, 2147483648 }
 0x4bf   : > { %v963_v39 = vshra.s32 %v1698_v42, 16  ;;  %v962_v4 = vand.u32 65535, %v1698_v42 }
 0x4c1   : > { %v1701_v44 = vcvt.s32.f32 %v963_v39  ;;  %v964_v25 = vcvt.s32.f32 %v962_v4  ;;  %v1108_v4 = vld [vmem:[#allocation2 + $0x8] sm:$0xff] }
 0x4c2   : > { %1126 = vmatpush.msra.mxu0 %v1108_v4  ;;  %1149 = vmatpush.msra.mxu1 %v1108_v4 }
 0x4c3   : > { %v847_v46 = vpop.xlane.xlu1 %846  ;;  %966 = vmax.xlane.f32.xlu0 %v1701_v44 }
 0x4c4   : > { %v848_v48 = vcvt.f32.s32 %v847_v46 }
 0x4c6   : > { %v851_v49 = vadd.s32 %v850_v47, %v848_v48 }
 0x4c8   : > { %v869_v55 = vand.u32 15, %v851_v49 }
 0x4ca   : > { %v873_v56 = vsub.s32 15, %v869_v55 }
 0x4cb   : > { %v832_v57 = vpop.xlane.xlu2 %831 }
 0x4cc   : > { %v833_v28 = vcvt.f32.s32 %v832_v57  ;;  %vm955_vm7 = vcmp.eq.s32.totalorder %v1617_v33, %v873_v56 }
 0x4cd   : > { %v959_v59 = vsel %vm955_vm7, 4294967295, %v1650_v45 }
 0x4ce   : > { %v836_v60 = vadd.s32 %v835_v58, %v833_v28  ;;  %v991_v61 = vsel %vm247_vm0, %v959_v59, 2147483648 }
 0x4cf   : > { %v993_v0 = vshra.s32 %v991_v61, 16  ;;  %v992_v29 = vand.u32 65535, %v991_v61 }
 0x4d0   : > { %v868_v1 = vand.u32 15, %v836_v60 }
 0x4d1   : > { %v995_v2 = vcvt.s32.f32 %v993_v0  ;;  %v994_v31 = vcvt.s32.f32 %v992_v29 }
 0x4d2   : > { %v872_v3 = vsub.s32 15, %v868_v1 }
 0x4d3   : > { %996 = vmax.xlane.f32.xlu0 %v995_v2  ;;  %v862_v8 = vpop.xlane.xlu1 %861 }
 0x4d4   : > { %v876_v9 = vperm.slane %v872_v3, %v1658_v52  ;;  %v863_v11 = vcvt.f32.s32 %v862_v8  ;;  %vm954_vm3 = vcmp.eq.s32.totalorder %v1617_v33, %v872_v3 }
 0x4d5   : > { %v958_v45 = vsel %vm954_vm3, 4294967295, %v1667_v32  ;;  %v878_v32 = vperm.slane %v873_v56, %v1617_v33  ;;  %v1486_v56 = vmov 0  }
 0x4d6   : > { %v866_v12 = vadd.s32 %v865_v7, %v863_v11  ;;  %v877_v13 = vsel %vm716_vm4, %v876_v9, %v875_v53  ;;  %v976_v14 = vsel %vm247_vm0, %v958_v45, 2147483648  ;;  %1369 = vset.pattern.permute.xlu0 %v1486_v56 }
 0x4d7   : > { %vm894_vm5 = vcmp.eq.s32.totalorder %v1661_v51, %v877_v13  ;;  %v978_v62 = vshra.s32 %v976_v14, 16  ;;  %vm893_vm6 = vcmp.eq.s32.totalorder %v1655_v50, %v877_v13  ;;  %v977_v35 = vand.u32 65535, %v976_v14 }
 0x4d8   : > { %v870_v15 = vand.u32 15, %v866_v12  ;;  %1286 = vmatpush.msk.msra.mxu2 %vm894_vm5, %v1484_v6 }
 0x4d9   : > { %v980_v16 = vcvt.s32.f32 %v978_v62  ;;  %v979_v37 = vcvt.s32.f32 %v977_v35 }
 0x4da   : > { %v874_v17 = vsub.s32 15, %v870_v15  ;;  %1287 = vmatpush.msk.msra.mxu2 %vm893_vm6, %v1484_v6 }
 0x4db   : > { %981 = vmax.xlane.f32.xlu1 %v980_v16 }
 0x4dc   : > { %v879_v18 = vperm.slane %v874_v17, %v1658_v52  ;;  %vm956_vm8 = vcmp.eq.s32.totalorder %v1617_v33, %v874_v17 }
 0x4dd   : > { %v960_v19 = vsel %vm956_vm8, 4294967295, %v1680_v10  ;;  %v542_v10 = vld [vmem:[%s1806_s3 + $0x8] sm:$0xff] }
 0x4de   : > { %v880_v20 = vsel %vm716_vm4, %v879_v18, %v878_v32  ;;  %v1006_v21 = vsel %vm247_vm0, %v960_v19, 2147483648  ;;  %1266 = vmatmul.msk.f32.gmra.mxu0 %vm370_vm9, %v542_v10  ;;  %1270 = vmatmul.msk.f32.gmra.mxu1 %vm370_vm9, %v542_v10 }
 0x4df   : > { %vm896_vm10 = vcmp.eq.s32.totalorder %v1661_v51, %v880_v20  ;;  %v1008_v22 = vshra.s32 %v1006_v21, 16  ;;  %vm895_vm11 = vcmp.eq.s32.totalorder %v1655_v50, %v880_v20  ;;  %v1007_v40 = vand.u32 65535, %v1006_v21  ;;  %v574_v43 = vpop.f32.mrf.mxu0 }
 0x4e0   : > { %1289 = vmatpush.msk.msra.mxu3 %vm896_vm10, %v1484_v6  ;;  %1278 = vmatmul.msk.f32.vlgmr.msrb.gmra.mxu2 %vm247_vm0, %v574_v43 }
 0x4e1   : > { %v1010_v23 = vcvt.s32.f32 %v1008_v22  ;;  %v1009_v42 = vcvt.s32.f32 %v1007_v40 }
 0x4e2   : > { %1290 = vmatpush.msk.msra.mxu3 %vm895_vm11, %v1484_v6 }
 0x4e3   : > { %1011 = vmax.xlane.f32.xlu1 %v1010_v23 }
 0x4e6   : > { %1267 = vmatmul.msk.f32.gmra.mxu0 %vm370_vm9, %v543_v26  ;;  %1271 = vmatmul.msk.f32.gmra.mxu1 %vm370_vm9, %v543_v26 }
 0x536   : > { %v967_v5 = vpop.xlane.xlu0 %966 }
 0x537   : > { %vm968_vm12 = vcmp.eq.f32.partialorder %v1701_v44, %v967_v5  ;;  %v604_v44 = vpop.f32.mrf.mxu1  ;;  %v973_v49 = vcvt.f32.s32 %v967_v5  ;;  %v1107_v5 = vld [vmem:[#allocation2] sm:$0xff] }
 0x538   : > { %v969_v27 = vsel %vm968_vm12, %v964_v25, -inf  ;;  %1281 = vmatmul.msk.f32.vlgmr.msrb.gmra.mxu3 %vm247_vm0, %v604_v44  ;;  %1127 = vmatpush.msra.mxu0 %v1107_v5 }
 0x539   : > { %970 = vmax.xlane.f32.xlu2 %v969_v27  ;;  %v974_v57 = vshll.u32 %v973_v49, 16  ;;  %1150 = vmatpush.msra.mxu1 %v1107_v5 }
 0x546   : > { %v997_v30 = vpop.xlane.xlu0 %996 }
 0x547   : > { %vm998_vm13 = vcmp.eq.f32.partialorder %v995_v2, %v997_v30  ;;  %v1003_v60 = vcvt.f32.s32 %v997_v30 }
 0x548   : > { %v999_v34 = vsel %vm998_vm13, %v994_v31, -inf }
 0x549   : > { %1000 = vmax.xlane.f32.xlu1 %v999_v34  ;;  %v1004_v3 = vshll.u32 %v1003_v60, 16 }
 0x54e   : > { %v982_v36 = vpop.xlane.xlu1 %981 }
 0x54f   : > { %vm983_vm14 = vcmp.eq.f32.partialorder %v980_v16, %v982_v36  ;;  %v988_v58 = vcvt.f32.s32 %v982_v36 }
 0x550   : > { %v984_v38 = vsel %vm983_vm14, %v979_v37, -inf }
 0x551   : > { %985 = vmax.xlane.f32.xlu0 %v984_v38  ;;  %v989_v63 = vshll.u32 %v988_v58, 16 }
 0x556   : > { %v1012_v41 = vpop.xlane.xlu1 %1011 }
 0x557   : > { %vm1013_vm15 = vcmp.eq.f32.partialorder %v1010_v23, %v1012_v41  ;;  %v1018_v8 = vcvt.f32.s32 %v1012_v41 }
 0x558   : > { %v1014_v39 = vsel %vm1013_vm15, %v1009_v42, -inf }
 0x559   : > { %1015 = vmax.xlane.f32.xlu2 %v1014_v39  ;;  %v1019_v12 = vshll.u32 %v1018_v8, 16 }
 0x55b   : > { %v577_v46 = vpop.f32.mrf.mxu0  ;;  %v607_v47 = vpop.f32.mrf.mxu1 }
 0x55c   : > { %1288 = vmatmul.msk.f32.vlgmr.msra.gmra.mxu2 %vm247_vm0, %v577_v46  ;;  %1291 = vmatmul.msk.f32.vlgmr.msra.gmra.mxu3 %vm247_vm0, %v607_v47 }
 0x563   : > { %v580_v20 = vpop.f32.mrf.mxu0  ;;  %v610_v10 = vpop.f32.mrf.mxu1 }
 0x565   : > { %642 = vperm.xlu0 %1369, %v639_v54  }
 0x5ac   : > { %v971_v48 = vpop.xlane.xlu2 %970 }
 0x5ad   : > { %v972_v55 = vcvt.f32.s32 %v971_v48 }
 0x5af   : > { %v975_v28 = vadd.s32 %v974_v57, %v972_v55 }
 0x5b1   : > { %v1021_v0 = vand.u32 15, %v975_v28 }
 0x5b3   : > { %v1025_v53 = vsub.s32 15, %v1021_v0 }
 0x5b5   : > { %v1029_v14 = vperm.slane %v1025_v53, %v1617_v33 }
 0x5bc   : > { %v1001_v59 = vpop.xlane.xlu1 %1000 }
 0x5bd   : > { %v1002_v1 = vcvt.f32.s32 %v1001_v59 }
 0x5bf   : > { %v1005_v9 = vadd.s32 %v1004_v3, %v1002_v1 }
 0x5c1   : > { %v1023_v62 = vand.u32 15, %v1005_v9 }
 0x5c3   : > { %v1027_v18 = vsub.s32 15, %v1023_v62 }
 0x5c4   : > { %v986_v61 = vpop.xlane.xlu0 %985 }
 0x5c5   : > { %v987_v2 = vcvt.f32.s32 %v986_v61  ;;  %v1032_v22 = vperm.slane %v1027_v18, %v1617_v33  ;;  %v771_v33 = vpop.f32.mrf.mxu2 }
 0x5c7   : > { %v990_v7 = vadd.s32 %v989_v63, %v987_v2 }
 0x5c9   : > { %v1022_v11 = vand.u32 15, %v990_v7 }
 0x5cb   : > { %v1026_v45 = vsub.s32 15, %v1022_v11 }
 0x5cc   : > { %v1016_v13 = vpop.xlane.xlu2 %1015 }
 0x5cd   : > { %v1030_v15 = vperm.slane %v1026_v45, %v1658_v52  ;;  %v1017_v16 = vcvt.f32.s32 %v1016_v13 }
 0x5cf   : > { %v1020_v17 = vadd.s32 %v1019_v12, %v1017_v16  ;;  %v1031_v32 = vsel %vm716_vm4, %v1030_v15, %v1029_v14 }
 0x5d0   : > { %vm1048_vm9 = vcmp.eq.s32.totalorder %v1661_v51, %v1031_v32  ;;  %vm1047_vm1 = vcmp.eq.s32.totalorder %v1655_v50, %v1031_v32 }
 0x5d1   : > { %v1024_v19 = vand.u32 15, %v1020_v17  ;;  %1296 = vmatpush.msk.msrb.mxu2 %vm1048_vm9, %v1484_v6 }
 0x5d3   : > { %v1028_v21 = vsub.s32 15, %v1024_v19  ;;  %1297 = vmatpush.msk.msrb.mxu2 %vm1047_vm1, %v1484_v6 }
 0x5d4   : > { %1298 = vmatmul.msk.f32.vlgmr.msrb.gmra.mxu2 %vm247_vm0, %v580_v20 }
 0x5d5   : > { %v1033_v23 = vperm.slane %v1028_v21, %v1658_v52  ;;  %v794_v52 = vpop.f32.mrf.mxu3 }
 0x5d7   : > { %v1034_v24 = vsel %vm716_vm4, %v1033_v23, %v1032_v22  ;;  %v643_v25 = vpop.permute.xlu0 %642 }
 0x5d8   : > { %vm1050_vm2 = vcmp.eq.s32.totalorder %v1661_v51, %v1034_v24  ;;  %vm1049_vm7 = vcmp.eq.s32.totalorder %v1655_v50, %v1034_v24  ;;  %v797_v26 = vadd.f32 %v771_v33, %v643_v25 }
 0x5d9   : > { %1299 = vmatpush.msk.msrb.mxu3 %vm1050_vm2, %v1484_v6 }
 0x5db   : > { %1300 = vmatpush.msk.msrb.mxu3 %vm1049_vm7, %v1484_v6  ;;  %v798_v6 = vadd.f32 %v794_v52, %v643_v25 }
 0x5dc   : > { %1301 = vmatmul.msk.f32.vlgmr.msrb.gmra.mxu3 %vm247_vm0, %v610_v10 }
 0x5df   : > { %v925_v51 = vpop.f32.mrf.mxu2  ;;  %v948_v29 = vpop.f32.mrf.mxu3 }
 0x5e0   : > { %v951_v27 = vadd.f32 %v925_v51, %v797_v26  ;;  %v952_v31 = vadd.f32 %v948_v29, %v798_v6 }
 0x657   : > { %v1079_v50 = vpop.f32.mrf.mxu2 }
 0x658   : > { %v1105_v30 = vadd.f32 %v1079_v50, %v951_v27 }
 0x65a   : > { %1302 = vmatmul.msk.f32.vlgmr.msra.gmra.mxu0 %vm247_vm0, %v1105_v30 }
 0x65f   : > { %v1102_v34 = vpop.f32.mrf.mxu3 }
 0x660   : > { %v1106_v35 = vadd.f32 %v1102_v34, %v952_v31 }
 0x662   : > { %1303 = vmatmul.msk.f32.vlgmr.msra.gmra.mxu1 %vm247_vm0, %v1106_v35 }
 0x6d7   : > { %v1129_v36 = vpop.f32.mrf.mxu0 }
 0x6d8   : > { %1155 = vst.msk [vmem:[%s235_s23] sm:$0xff] %vm247_vm0, %v1129_v36 }
 0x6df   : > { %v1152_v37 = vpop.f32.mrf.mxu1 }
 0x6e0   : > { %1156 = vst.msk [vmem:[%s235_s23 + $0x8] sm:$0xff] %vm247_vm0, %v1152_v37 }
 0x6e1   : > { %1439 = shalt.err (!%p1436_p8)
}
 0x6e2   : > { %s1487_s15 = smov 128   ;;  %s1488_s16 = smov 8  }
 0x6e3   : > { %1314 = dma.vmem_to_hbm [thread:$0]  (%p1557_p5), %s1171_s6, 256, %s1173_s7, %s1158_s8, %s1487_s15, %s1487_s15, %s1488_s16  }
 0x6e4 PF: > { %p1326_p9 = scmp.ge.s32.totalorder %s1478_s21, 2  ;;  %s1187_s17 = sand.u32 1, %s1466_s18  }
 0x6e5   : > { %s1188_s23 = scalar_lea.sflag [#allocation4], %s1187_s17 }
 0x6e6   : > { %p1321_p10 = pnand %p1326_p9, %p1561_p6 }
 0x6e8   : > { %p1322_p11 = pneg %p1321_p10 }
 0x6ea   : > { %1461 = dma.done.wait (%p1322_p11), %s1188_s23, 256  }
 0x6eb   : > { %1463 = vsyncadd (%p1322_p11), %s1188_s23, 4294967040  ;;  %p16_p12 = scmp.ge.s32.totalorder %s1544_s24, 4   ;;  %s1811_s18 = smov %s1470_s19 }
 0x6ec   : > { %s1812_s19 = smov %s1474_s20  ;;  %s1813_s20 = smov %s1555_s27 }
 0x6ed   : > { %s1814_s21 = smov %s1544_s24  ;;  %18 = sbr.rel (!%p16_p12) target bundleno = 4 (0x4), region = 80 }
 0x6f2   :  { %1194 = vsyncpa [#allocation3], 1 }
 0x6f3   :  { %1196 = vsyncpa [#allocation3 + $0x1], 1 }
 0x6f4   :  { %1197 = vsyncpa [#allocation4], 1 }
 0x6f5   :  { %1199 = vsyncpa [#allocation4 + $0x1], 1 }

</bundles_post_ra>
